<compile_context>
chip_gen: v6e
topology: v6e:2x2x1
jax: 0.10.0
libtpu: 0.0.40
codegen_flags: <defaults>
</compile_context>

<pallas_src>
import math

import jax
import jax.numpy as jnp
from jax.experimental import pallas as pl
from jax.experimental.pallas import tpu as pltpu


def _round_up(v: int, m: int) -> int:
    return ((v + m - 1) // m) * m


def _vmem_limit_bytes() -> int:
    """3/4 of the physical per-core VMEM (96 MiB on v5e/v6e, 48 MiB on v7x)."""
    try:
        cap = getattr(pltpu.get_tpu_info(), "vmem_capacity_bytes", None)
    except Exception:
        cap = None
    if not cap:
        cap = 64 << 20  # conservative default: v7x per-TensorCore VMEM
    return int(min(cap * 3 // 4, 100 << 20))


# ------------------------------- kernels ------------------------------------


def _linear_kernel_fused(x_ref, w_ref, b_ref, o_ref):
    # Whole K in one step: fused matmul + bias + cast, no scratch, 2-D grid.
    o_ref[...] = (
        jnp.dot(x_ref[...], w_ref[...], preferred_element_type=jnp.float32)
        + b_ref[...]
    ).astype(o_ref.dtype)


def _linear_kernel_kloop_f32out(x_ref, w_ref, b_ref, o_ref):
    # K tiled; the f32 output block stays VMEM-resident across the k axis, so
    # accumulate straight into it (no acc scratch -> more VMEM for tiles).
    k = pl.program_id(2)

    @pl.when(k == 0)
    def _():
        o_ref[...] = jnp.zeros_like(o_ref)

    o_ref[...] += jnp.dot(x_ref[...], w_ref[...], preferred_element_type=jnp.float32)

    @pl.when(k == pl.num_programs(2) - 1)
    def _():
        o_ref[...] = o_ref[...] + b_ref[...]


def _linear_kernel_kloop_acc(x_ref, w_ref, b_ref, o_ref, acc_ref):
    # K tiled, non-f32 output: f32 VMEM accumulator, bias + cast on last step.
    k = pl.program_id(2)

    @pl.when(k == 0)
    def _():
        acc_ref[...] = jnp.zeros_like(acc_ref)

    acc_ref[...] += jnp.dot(x_ref[...], w_ref[...], preferred_element_type=jnp.float32)

    @pl.when(k == pl.num_programs(2) - 1)
    def _():
        o_ref[...] = (acc_ref[...] + b_ref[...]).astype(o_ref.dtype)


# ----------------------------- tile planning --------------------------------


def _plan_tiles(K, N, itemsize, budget, m_align, tm_max, tn_max, tk_max):
    """Returns (tm_cap, tk, tn) sized against the per-generation VMEM budget."""

    def working_set(tm, tk, tn):
        # double-buffered x / w / out tiles + worst-case f32 accumulator
        return (2 * tm * tk * itemsize + 2 * tk * tn * itemsize
                + 2 * tm * tn * 4 + tm * tn * 4)

    # 1) Weight-resident: one (K, N) weight block, fetched from HBM once per
    #    call no matter how many M tiles stream through.
    for cand in (tm_max, 256, 128):
        tm = max(_round_up(min(cand, tm_max), m_align), m_align)
        if working_set(tm, K, N) <= budget:
            return tm, K, N

    # 2) Tiled fallback for big heads: lane-aligned N/K tiles that divide the
    #    (unpadded) dims; full-extent blocks when they are not 128-aligned.
    if N % 128 == 0:
        tn = min(tn_max, N)
        while tn > 128 and N % tn != 0:
            tn -= 128
        if N % tn != 0:
            tn = N
    else:
        tn = N
    if K % 128 == 0 and K > tk_max:
        tk = (min(tk_max, K) // 128) * 128
        while tk > 128 and K % tk != 0:
            tk -= 128
        if K % tk != 0:
            tk = K
    else:
        tk = K
    tm = max(_round_up(tm_max, m_align), m_align)
    while tm > 2 * m_align and working_set(tm, tk, tn) > budget:
        tm = max(_round_up(tm // 2, m_align), m_align)
    return tm, tk, tn


def _pick_tm(M, m_align, tm_cap):
    """Adaptive M tile: <m_align wasted rows for small M, <=127 for large M."""
    Ma = _round_up(max(M, 1), m_align)
    if Ma <= tm_cap:
        return Ma, Ma  # single M tile
    best_tm, best_waste = None, None
    for cand in (tm_cap, 256, 128):
        tm = max(_round_up(min(cand, tm_cap), m_align), m_align)
        waste = _round_up(M, tm) - M
        if best_waste is None or waste < best_waste:
            best_tm, best_waste = tm, waste
    return best_tm, _round_up(M, best_tm)


# ------------------------------ pallas wrapper -------------------------------


def _linear_pallas(x2d, w_t, b_row, *, out_dtype, tm_cap, tk, tn, m_align,
                   vmem_limit):
    """x2d: (M, K); w_t: (K, N) pre-transposed weight; b_row: (1, N) f32 bias."""
    M, K = x2d.shape
    N = w_t.shape[1]
    tm, Mp = _pick_tm(M, m_align, tm_cap)

    if Mp != M:
        # Only hit for sublane-unaligned M; at most tm-1 (<128) padded rows.
        x2d = jnp.pad(x2d, ((0, Mp - M), (0, 0)))

    gm, gn, gk = Mp // tm, N // tn, K // tk

    # v7x has 2 TensorCores: if the weight-resident plan collapsed the grid to
    # a single cell, split M so the "parallel" axes can feed both cores.
    if gm * gn * gk == 1 and Mp >= 256 and (Mp // 2) % m_align == 0:
        tm, gm = Mp // 2, 2

    x_b = jnp.dtype(x2d.dtype).itemsize
    w_b = jnp.dtype(w_t.dtype).itemsize
    o_b = jnp.dtype(out_dtype).itemsize
    cost = pl.CostEstimate(
        flops=2 * Mp * N * K,
        transcendentals=0,
        # x re-read per N tile, weight re-read per M tile, output written once.
        bytes_accessed=Mp * K * x_b * gn + K * N * w_b * gm + Mp * N * o_b,
    )

    if gk == 1:
        grid = (gm, gn)
        kernel = _linear_kernel_fused
        in_specs = [
            pl.BlockSpec((tm, tk), lambda i, j: (i, 0)),
            pl.BlockSpec((tk, tn), lambda i, j: (0, j)),
            pl.BlockSpec((1, tn), lambda i, j: (0, j)),
        ]
        out_specs = pl.BlockSpec((tm, tn), lambda i, j: (i, j))
        scratch = []
        dims = ("parallel", "parallel")
    else:
        grid = (gm, gn, gk)
        in_specs = [
            pl.BlockSpec((tm, tk), lambda i, j, k: (i, k)),
            pl.BlockSpec((tk, tn), lambda i, j, k: (k, j)),
            pl.BlockSpec((1, tn), lambda i, j, k: (0, j)),
        ]
        out_specs = pl.BlockSpec((tm, tn), lambda i, j, k: (i, j))
        if jnp.dtype(out_dtype) == jnp.dtype(jnp.float32):
            kernel = _linear_kernel_kloop_f32out
            scratch = []
        else:
            kernel = _linear_kernel_kloop_acc
            scratch = [pltpu.VMEM((tm, tn), jnp.float32)]
        dims = ("parallel", "parallel", "arbitrary")

    y = pl.pallas_call(
        kernel,
        out_shape=jax.ShapeDtypeStruct((Mp, N), out_dtype),
        grid_spec=pltpu.PrefetchScalarGridSpec(
            num_scalar_prefetch=0,
            grid=grid,
            in_specs=in_specs,
            out_specs=out_specs,
            scratch_shapes=scratch,
        ),
        compiler_params=pltpu.CompilerParams(
            dimension_semantics=dims,
            vmem_limit_bytes=vmem_limit,
        ),
        cost_estimate=cost,
    )(x2d, w_t, b_row)

    return y if Mp == M else y[:M]


# --------------------------------- module ------------------------------------


class BackboneModelInterfacePallas:
    """JAX/Pallas port of BackboneModelInterface: a single nn.Linear head."""

    def __init__(self, linear_in_channels, linear_out_channels, key, *,
                 compute_dtype=jnp.bfloat16, tm_max=512, tn_max=1024,
                 tk_max=1024, min_pallas_flops=1 << 23):
        self.in_ch = int(linear_in_channels)
        self.out_ch = int(linear_out_channels)
        self.compute_dtype = jnp.dtype(compute_dtype)
        self.min_pallas_flops = int(min_pallas_flops)

        kw, kb = jax.random.split(key)
        bound = 1.0 / math.sqrt(self.in_ch)
        # Matches nn.Linear's default U(-1/sqrt(fan_in), 1/sqrt(fan_in)) init.
        self.weight = jax.random.uniform(
            kw, (self.out_ch, self.in_ch), jnp.float32, -bound, bound)
        self.bias = jax.random.uniform(
            kb, (self.out_ch,), jnp.float32, -bound, bound)

        # Weights-stationary head: transpose + cast ONCE at init.  K and N are
        # never padded, so there is no per-call pad/slice along those axes.
        # TODO(synk): optional fp8 weight storage on v7x for a further 2x HBM cut.
        self.weight_t = self.weight.T.astype(self.compute_dtype)   # (K, N)
        self.bias_row = self.bias.reshape(1, self.out_ch)           # f32

        itemsize = self.compute_dtype.itemsize
        self.m_align = max(8, 32 // itemsize)    # 8 rows f32 / 16 rows bf16
        self.vmem_limit = _vmem_limit_bytes()
        budget = int(self.vmem_limit * 0.9)
        self.tm_cap, self.tk, self.tn = _plan_tiles(
            self.in_ch, self.out_ch, itemsize, budget, self.m_align,
            tm_max, tn_max, tk_max)

    def __call__(self, x: jax.Array) -> jax.Array:
        lead = x.shape[:-1]
        out_dtype = x.dtype
        x2d = x.reshape(-1, self.in_ch).astype(self.compute_dtype)
        M = x2d.shape[0]

        if 2 * M * self.in_ch * self.out_ch < self.min_pallas_flops:
            # Tiny head: pallas_call launch + per-step overhead loses to XLA's
            # fused matmul, so dispatch to plain JAX.
            y2d = (jnp.dot(x2d, self.weight_t, preferred_element_type=jnp.float32)
                   + self.bias_row).astype(out_dtype)
        else:
            y2d = _linear_pallas(
                x2d, self.weight_t, self.bias_row, out_dtype=out_dtype,
                tm_cap=self.tm_cap, tk=self.tk, tn=self.tn,
                m_align=self.m_align, vmem_limit=self.vmem_limit)
        return y2d.reshape(*lead, self.out_ch)


if __name__ == "__main__":
    key = jax.random.PRNGKey(0)
    k_p1, k_p2, k_x1, k_x2 = jax.random.split(key, 4)

    # 1) Exact f32 path at the module's small demo shapes.
    #    min_pallas_flops=0 forces the pallas_call path so the kernel runs.
    batch, seq, in_ch, out_ch = 2, 8, 32, 16
    model = BackboneModelInterfacePallas(
        in_ch, out_ch, k_p1, compute_dtype=jnp.float32, min_pallas_flops=0)
    x = jax.random.normal(k_x1, (batch, seq, in_ch), jnp.float32)
    y = jax.block_until_ready(model(x))
    y_ref = x @ model.weight.T + model.bias
    assert y.shape == (batch, seq, out_ch)
    assert jnp.allclose(y, y_ref, atol=1e-5, rtol=1e-5), "f32 path mismatch"

    # 2) Default bf16 storage/compute (f32 accumulate) on lane-aligned dims:
    #    exercises the no-pad / no-slice fast path of the kernel.
    in_ch2, out_ch2 = 256, 128
    model2 = BackboneModelInterfacePallas(in_ch2, out_ch2, k_p2,
                                          min_pallas_flops=0)
    x2 = jax.random.normal(k_x2, (2, 64, in_ch2), jnp.float32)
    y2 = jax.block_until_ready(model2(x2))
    y2_ref = x2 @ model2.weight.T + model2.bias
    assert y2.shape == (2, 64, out_ch2)
    assert jnp.allclose(y2, y2_ref, atol=5e-2, rtol=5e-2), "bf16 path mismatch"

    print("KERNEL_OK")
</pallas_src>

<mosaic_0001>
module attributes {stable_mosaic.version = 11 : i64} {
  func.func @_linear_kernel_fused(%arg0: i32, %arg1: i32, %arg2: memref<16x32xf32, #tpu.memory_space<vmem>>, %arg3: memref<32x16xf32, #tpu.memory_space<vmem>>, %arg4: memref<1x16xf32, #tpu.memory_space<vmem>>, %arg5: memref<16x16xf32, #tpu.memory_space<vmem>>) attributes {dimension_semantics = [#tpu.dimension_semantics<parallel>, #tpu.dimension_semantics<parallel>], iteration_bounds = array<i64: 1, 1>, scalar_prefetch = 0 : i64, scratch_operands = 0 : i64, tpu.core_type = #tpu.core_type<tc>, window_params = [{transform_indices = @transform_0, window_bounds = array<i64: 16, 32>}, {transform_indices = @transform_1, window_bounds = array<i64: 32, 16>}, {transform_indices = @transform_2, window_bounds = array<i64: 1, 16>}, {transform_indices = @transform_3, window_bounds = array<i64: 16, 16>}]} {
    %c0 = arith.constant 0 : index
    %c0_0 = arith.constant 0 : index
    %0 = vector.load %arg2[%c0, %c0_0] : memref<16x32xf32, #tpu.memory_space<vmem>>, vector<16x32xf32>
    %c0_1 = arith.constant 0 : index
    %c0_2 = arith.constant 0 : index
    %1 = vector.load %arg3[%c0_1, %c0_2] : memref<32x16xf32, #tpu.memory_space<vmem>>, vector<32x16xf32>
    %cst = arith.constant dense<0.000000e+00> : vector<16x16xf32>
    %2 = tpu.matmul %0, %1, %cst {dimension_numbers = #tpu.dot_dimension_numbers<[1], [0], [0], [1], [0, 0, 1, 1], [], []>} : vector<16x32xf32>, vector<32x16xf32>, vector<16x16xf32> -> vector<16x16xf32>
    %c0_3 = arith.constant 0 : index
    %c0_4 = arith.constant 0 : index
    %3 = vector.load %arg4[%c0_3, %c0_4] : memref<1x16xf32, #tpu.memory_space<vmem>>, vector<1x16xf32>
    %4 = vector.broadcast %3 : vector<1x16xf32> to vector<16x16xf32>
    %5 = arith.addf %2, %4 : vector<16x16xf32>
    %c0_5 = arith.constant 0 : index
    %c0_6 = arith.constant 0 : index
    %6 = vector.load %arg5[%c0_5, %c0_6] : memref<16x16xf32, #tpu.memory_space<vmem>>, vector<16x16xf32>
    tpu.vector_store %arg5[%c0_5, %c0_6], %5 {strides = array<i32>} : memref<16x16xf32, #tpu.memory_space<vmem>>, vector<16x16xf32>,
    return
  }
  func.func @transform_0(%arg0: i32, %arg1: i32) -> (i32, i32) {
    %c0_i32 = arith.constant 0 : i32
    %c0_i32_0 = arith.constant 0 : i32
    return %arg0, %c0_i32 : i32, i32
  }
  func.func @transform_1(%arg0: i32, %arg1: i32) -> (i32, i32) {
    %c0_i32 = arith.constant 0 : i32
    %c0_i32_0 = arith.constant 0 : i32
    return %c0_i32, %arg1 : i32, i32
  }
  func.func @transform_2(%arg0: i32, %arg1: i32) -> (i32, i32) {
    %c0_i32 = arith.constant 0 : i32
    %c0_i32_0 = arith.constant 0 : i32
    return %c0_i32, %arg1 : i32, i32
  }
  func.func @transform_3(%arg0: i32, %arg1: i32) -> (i32, i32) {
    %c0_i32 = arith.constant 0 : i32
    return %arg0, %arg1 : i32, i32
  }
}

</mosaic_0001>

<bundles_post_ra>
// kernel: tpu_custom_call.1
= control target key start
LH: loop header
LB: loop body
LE: loop exit
PB: predicated region body
PF: predicated region fallthrough
CT: control target
= control target key end

     0   :  { %vm28_vm0 = vcmask 261120   ;;  %s221_s0 = inlined_call_operand.vmem [shape: f32[16,32], index: 0, kind: input, shape index: {}]   ;;  %s222_s1 = inlined_call_operand.vmem [shape: f32[32,16], index: 1, kind: input, shape index: {}]   ;;  %s223_s2 = inlined_call_operand.vmem [shape: f32[1,16], index: 2, kind: input, shape index: {}]   ;;  %s224_s3 = inlined_call_operand.hbm [shape: f32[16,16], index: 3, kind: output, shape index: {}]  }
   0x1   :  { %v20_v0 = vld [vmem:[%s222_s1 + $0x18] sm:$0xff]  ;;  %v19_v1 = vld [vmem:[%s222_s1 + $0x10] sm:$0xff]  ;;  %v15_v2 = vld [vmem:[%s221_s0] sm:$0xff] }
   0x2   :  { %138 = vmatprep.subr.mxu0 %v20_v0  ;;  %v18_v3 = vld [vmem:[%s222_s1 + $0x8] sm:$0xff]  ;;  %146 = vmatprep.mubr.msk.f32.mxu0 %vm28_vm0, %v15_v2 }
   0x3   :  { %139 = vmatpush3.msra.mxu0 %v20_v0 }
   0x4   :  { %8 = vsyncpa [#allocation3], 0  ;;  %140 = vmatprep.subr.mxu0 %v19_v1  ;;  %v17_v4 = vld [vmem:[%s222_s1] sm:$0xff]  ;;  %v16_v5 = vld [vmem:[%s221_s0 + $0x8] sm:$0xff]  ;;  %s174_s26 = smov [#allocation2]   ;;  %vm110_vm1 = vcmask 130048  }
   0x5   :  { %141 = vmatpush3.msra.mxu0 %v19_v1  ;;  %v129_v6 = vld [vmem:[%s223_s2] ss:$0 sm:$0xff]  ;;  %s118_s27 = sshll.u32 %s174_s26, 4  ;;  %s119_s27 = int_to_ptr.vmem [resolvable:$true] %s118_s27 }
   0x6   :  { %142 = vmatprep.subr.mxu0 %v18_v3  ;;  %s152_s1 = scalar_lea.vmem %s119_s27, 256  ;;  %p157_p1 = scmp.lt.s32.totalorder %s119_s27, %s119_s27 }
   0x7   :  { %143 = vmatpush3.msra.mxu0 %v18_v3  ;;  %p153_p0 = scmp.ne.s32.totalorder %s119_s27, %s152_s1  ;;  %p158_p2 = scmp.lt.s32.totalorder %s152_s1, %s152_s1 }
   0x8   :  { %144 = vmatprep.subr.mxu0 %v17_v4 }
   0x9   :  { %145 = vmatpush3.msra.mxu0 %v17_v4  ;;  %p159_p3 = por %p158_p2, %p157_p1 }
   0xa   :  { %147 = vmatmul.mubr.msk.f32.vlgmr.msra.gmra.mxu0 %vm28_vm0, %v16_v5 }
   0xb   :  { %p160_p4 = pnand %p159_p3, %p153_p0 }
  0xca   :  { %v148_v7 = vpop.f32.mrf.mxu0 }
  0xcb   :  { %v107_v8 = vadd.f32 %v148_v7, %v129_v6 }
  0xcc   :  { %v101_v9 = vpop.f32.mrf.mxu0 }
  0xcd   :  { %112 = vst.msk [vmem:[#allocation2 + $0x8] sm:$0xff] %vm110_vm1, %v107_v8  ;;  %v102_v10 = vadd.f32 %v129_v6, %v101_v9 }
  0xcf   :  { %111 = vst.msk [vmem:[#allocation2] sm:$0xff] %vm110_vm1, %v102_v10 }
  0xd0   :  { %163 = shalt.err (!%p160_p4)
}
  0xd1   :  { %s175_s0 = smov 128   ;;  %s176_s28 = smov 8  }
  0xd2   :  { %124 = dma.vmem_to_hbm [thread:$0]  %s119_s27, 256, %s224_s3, [#allocation3], %s175_s0, %s175_s0, %s176_s28  }
  0xd3   :  { %172 = dma.done.wait [#allocation3], 256  }
  0xd4   :  { %173 = vsyncadd [#allocation3], 4294967040 }
  0xd5   :  { %128 = vsyncpa [#allocation3], 1 }

</bundles_post_ra>
